<compile_context>
chip_gen: v6e
topology: v6e:2x2x1
jax: 0.10.0
libtpu: 0.0.40
codegen_flags: <defaults>
</compile_context>

<pallas_src>
import functools

import jax
import jax.numpy as jnp
from jax import lax
from jax.experimental import pallas as pl
from jax.experimental.pallas import tpu as pltpu

EPS = 1e-5
NEG_SLOPE = 0.2


def _round_up(v, m):
    return (v + m - 1) // m * m


def _vmem_limit_bytes():
    """~3/4 of the chip's VMEM (48 MiB on v7x, 96 MiB on v5e/v6e); safe fallback."""
    try:
        cap = int(pltpu.get_tpu_info().vmem_capacity_bytes)
        return max(32 * 1024 * 1024, (cap * 3) // 4)
    except Exception:
        return 32 * 1024 * 1024


def _fused_kernel(x_ref, w_ref, g_ref, bt_ref, o_ref, ssum_ref, ssq_ref, *,
                  k, Wp, Wo, Sv, count):
    """One image per grid step: conv (in-kernel im2col) + resident BN stats;
    the last step normalizes the resident output and applies LeakyReLU."""
    i = pl.program_id(0)

    @pl.when(i == 0)
    def _init():
        ssum_ref[...] = jnp.zeros_like(ssum_ref)
        ssq_ref[...] = jnp.zeros_like(ssq_ref)

    slab = x_ref[0]                                   # (Cin_pad, Sp) flat padded image

    # In-kernel im2col: k*k shifted accumulating matmuls. The shift
    # s = kh*Wp + kw is a compile-time constant; each slice is lane-dense.
    y = None
    for kh in range(k):
        for kw in range(k):
            s = kh * Wp + kw
            t = jnp.dot(w_ref[kh * k + kw], slab[:, s:s + Sv],
                        preferred_element_type=jnp.float32)     # (Cout, Sv)
            y = t if y is None else y + t

    o_ref[i] = y                                      # raw conv into resident output

    # One-pass BN batch statistics over the valid columns (wp < Wo).  The
    # invalid columns are padded-row-layout positions that the wrapper crops.
    col = lax.broadcasted_iota(jnp.int32, (1, Sv), 1)
    ym = jnp.where((col % Wp) < Wo, y, 0.0)
    ssum_ref[...] += jnp.sum(ym, axis=1, keepdims=True)[None]    # (1, Cout, 1)
    ssq_ref[...] += jnp.sum(ym * ym, axis=1, keepdims=True)[None]

    @pl.when(i == pl.num_programs(0) - 1)
    def _finalize():
        inv_cnt = 1.0 / count
        mean = ssum_ref[...] * inv_cnt                            # (1, Cout, 1)
        var = jnp.maximum(ssq_ref[...] * inv_cnt - mean * mean, 0.0)
        scale = g_ref[...] * lax.rsqrt(var + EPS)
        shift = bt_ref[...] - mean * scale
        z = o_ref[...] * scale + shift                            # fused norm + affine
        o_ref[...] = jnp.where(z >= 0, z, NEG_SLOPE * z)          # LeakyReLU(0.2)


@functools.partial(jax.jit, static_argnames=("pad",))
def conv_bn_relu_pallas(x, w, b, gamma, beta, *, pad):
    """x: (N, Cin, H, W) f32; w: (Cout, Cin, k, k); b/gamma/beta: (Cout,).

    `b` (the conv bias) is accepted for interface parity with nn.Conv2d but is
    not used: train-mode BatchNorm subtracts the per-channel batch mean, which
    cancels the conv bias exactly.
    """
    del b
    N, Cin, H, W = x.shape
    Cout, _, k, _ = w.shape
    Hp, Wp = H + 2 * pad, W + 2 * pad
    Ho, Wo = Hp - k + 1, Wp - k + 1

    cin_p = _round_up(Cin, 8)              # sublane-align the contraction dim
    Sv = Ho * Wp                           # compute width in padded-row layout
    s_max = (k - 1) * (Wp + 1)             # largest in-kernel shift
    Sp = _round_up(max(Hp * Wp, Sv + s_max), 128)

    # One flat, zero-padded slab per image: (N, cin_p, Sp) -- no k*k duplication.
    xp = jnp.pad(x.astype(jnp.float32),
                 ((0, 0), (0, cin_p - Cin), (pad, pad), (pad, pad)))
    slab = jnp.pad(xp.reshape(N, cin_p, Hp * Wp),
                   ((0, 0), (0, 0), (0, Sp - Hp * Wp)))

    # Weights as k*k small (Cout, cin_p) matrices: wk[kh*k+kw] = w[:, :, kh, kw].
    wk = jnp.pad(w.astype(jnp.float32), ((0, 0), (0, cin_p - Cin), (0, 0), (0, 0)))
    wk = wk.transpose(2, 3, 0, 1).reshape(k * k, Cout, cin_p)

    g3 = gamma.astype(jnp.float32).reshape(1, Cout, 1)
    bt3 = beta.astype(jnp.float32).reshape(1, Cout, 1)

    out_flat = pl.pallas_call(
        functools.partial(_fused_kernel, k=k, Wp=Wp, Wo=Wo, Sv=Sv,
                          count=float(N * Ho * Wo)),
        out_shape=jax.ShapeDtypeStruct((N, Cout, Sv), jnp.float32),
        grid=(N,),
        in_specs=[
            pl.BlockSpec((1, cin_p, Sp), lambda i: (i, 0, 0)),       # per-image slab
            pl.BlockSpec((k * k, Cout, cin_p), lambda i: (0, 0, 0)),  # weights (resident)
            pl.BlockSpec((1, Cout, 1), lambda i: (0, 0, 0)),          # gamma
            pl.BlockSpec((1, Cout, 1), lambda i: (0, 0, 0)),          # beta
        ],
        # Resident output block (constant index map) = the VMEM-resident y.
        out_specs=pl.BlockSpec((N, Cout, Sv), lambda i: (0, 0, 0)),
        scratch_shapes=[pltpu.VMEM((1, Cout, 1), jnp.float32),        # sum(y)
                        pltpu.VMEM((1, Cout, 1), jnp.float32)],       # sum(y^2)
        compiler_params=pltpu.CompilerParams(
            dimension_semantics=("arbitrary",),   # stats/output resident across grid
            vmem_limit_bytes=_vmem_limit_bytes()),
    )(slab, wk, g3, bt3)

    # (N, Cout, Ho*Wp) -> (N, Cout, Ho, Wp) is a free trailing reshape; cropping
    # the padded W columns is the only remaining (cheap) XLA op. No NCHW permute.
    return out_flat.reshape(N, Cout, Ho, Wp)[:, :, :, :Wo]


def _reference(x, w, b, gamma, beta, pad):
    """Pure-JAX reference: PyTorch Conv2d + BatchNorm2d(train) + LeakyReLU(0.2)."""
    y = lax.conv_general_dilated(
        x, w, window_strides=(1, 1), padding=[(pad, pad), (pad, pad)],
        dimension_numbers=("NCHW", "OIHW", "NCHW"))
    y = y + b[None, :, None, None]
    mean = y.mean(axis=(0, 2, 3), keepdims=True)
    var = ((y - mean) ** 2).mean(axis=(0, 2, 3), keepdims=True)
    z = (y - mean) / jnp.sqrt(var + EPS)
    z = z * gamma[None, :, None, None] + beta[None, :, None, None]
    return jnp.where(z >= 0, z, NEG_SLOPE * z)


if __name__ == "__main__":
    # conv_bn_relu(in_ch=4, out_ch=8, k_size=3, padding_size=1)
    N, Cin, H, W = 2, 4, 16, 16
    Cout, k, pad = 8, 3, 1

    key = jax.random.PRNGKey(0)
    kx, kw, kb, kg, kbt = jax.random.split(key, 5)
    x = jax.random.normal(kx, (N, Cin, H, W), dtype=jnp.float32)
    w = jax.random.normal(kw, (Cout, Cin, k, k), dtype=jnp.float32) * 0.1
    b = jax.random.normal(kb, (Cout,), dtype=jnp.float32) * 0.1
    gamma = 1.0 + 0.1 * jax.random.normal(kg, (Cout,), dtype=jnp.float32)
    beta = 0.1 * jax.random.normal(kbt, (Cout,), dtype=jnp.float32)

    out = conv_bn_relu_pallas(x, w, b, gamma, beta, pad=pad)
    out = jax.block_until_ready(out)

    ref = _reference(x, w, b, gamma, beta, pad)
    assert out.shape == (N, Cout, H, W), out.shape
    err = float(jnp.max(jnp.abs(out - ref)))
    assert jnp.allclose(out, ref, rtol=1e-4, atol=1e-4), err

    print("KERNEL_OK")
</pallas_src>

<mosaic_0001>
module attributes {stable_mosaic.version = 11 : i64} {
  func.func @_fused_kernel(%arg0: i32, %arg1: memref<1x8x384xf32, #tpu.memory_space<vmem>>, %arg2: memref<9x8x8xf32, #tpu.memory_space<vmem>>, %arg3: memref<1x8x1xf32, #tpu.memory_space<vmem>>, %arg4: memref<1x8x1xf32, #tpu.memory_space<vmem>>, %arg5: memref<2x8x288xf32, #tpu.memory_space<vmem>>, %arg6: memref<1x8x1xf32, #tpu.memory_space<vmem>>, %arg7: memref<1x8x1xf32, #tpu.memory_space<vmem>>) attributes {dimension_semantics = [#tpu.dimension_semantics<arbitrary>], iteration_bounds = array<i64: 2>, scalar_prefetch = 0 : i64, scratch_operands = 2 : i64, tpu.core_type = #tpu.core_type<tc>, window_params = [{transform_indices = @transform_0, window_bounds = array<i64: 1, 8, 384>}, {pipeline_mode = #tpu.pipeline_mode<synchronous>, transform_indices = @transform_1, window_bounds = array<i64: 9, 8, 8>}, {pipeline_mode = #tpu.pipeline_mode<synchronous>, transform_indices = @transform_2, window_bounds = array<i64: 1, 8, 1>}, {pipeline_mode = #tpu.pipeline_mode<synchronous>, transform_indices = @transform_3, window_bounds = array<i64: 1, 8, 1>}, {pipeline_mode = #tpu.pipeline_mode<synchronous>, transform_indices = @transform_4, window_bounds = array<i64: 2, 8, 288>}]} {
    %c0_i32 = arith.constant 0 : i32
    %0 = arith.cmpi eq, %arg0, %c0_i32 : i32
    %1 = arith.extui %0 : i1 to i32
    %c0_i32_0 = arith.constant 0 : i32
    %2 = arith.cmpi ne, %1, %c0_i32_0 : i32
    scf.if %2 {
      %cst_53 = arith.constant 0.000000e+00 : f32
      %92 = vector.broadcast %cst_53 : f32 to vector<1x8x1xf32>
      %c0_54 = arith.constant 0 : index
      %c0_55 = arith.constant 0 : index
      %c0_56 = arith.constant 0 : index
      %93 = vector.load %arg6[%c0_54, %c0_55, %c0_56] : memref<1x8x1xf32, #tpu.memory_space<vmem>>, vector<1x8x1xf32>
      tpu.vector_store %arg6[%c0_54, %c0_55, %c0_56], %92 {strides = array<i32>} : memref<1x8x1xf32, #tpu.memory_space<vmem>>, vector<1x8x1xf32>,
      %cst_57 = arith.constant 0.000000e+00 : f32
      %94 = vector.broadcast %cst_57 : f32 to vector<1x8x1xf32>
      %c0_58 = arith.constant 0 : index
      %c0_59 = arith.constant 0 : index
      %c0_60 = arith.constant 0 : index
      %95 = vector.load %arg7[%c0_58, %c0_59, %c0_60] : memref<1x8x1xf32, #tpu.memory_space<vmem>>, vector<1x8x1xf32>
      tpu.vector_store %arg7[%c0_58, %c0_59, %c0_60], %94 {strides = array<i32>} : memref<1x8x1xf32, #tpu.memory_space<vmem>>, vector<1x8x1xf32>,
    } else {
    }
    %c0 = arith.constant 0 : index
    %c0_1 = arith.constant 0 : index
    %c0_2 = arith.constant 0 : index
    %3 = vector.load %arg1[%c0, %c0_1, %c0_2] : memref<1x8x384xf32, #tpu.memory_space<vmem>>, vector<1x8x384xf32>
    %4 = vector.shape_cast %3 : vector<1x8x384xf32> to vector<8x384xf32>
    %c0_3 = arith.constant 0 : index
    %c0_4 = arith.constant 0 : index
    %c0_5 = arith.constant 0 : index
    %5 = vector.load %arg2[%c0_3, %c0_4, %c0_5] : memref<9x8x8xf32, #tpu.memory_space<vmem>>, vector<1x8x8xf32>
    %6 = vector.shape_cast %5 : vector<1x8x8xf32> to vector<8x8xf32>
    %7 = vector.extract_strided_slice %4 {offsets = [0, 0], sizes = [8, 288], strides = [1, 1]} : vector<8x384xf32> to vector<8x288xf32>
    %cst = arith.constant dense<0.000000e+00> : vector<8x288xf32>
    %8 = tpu.matmul %6, %7, %cst {dimension_numbers = #tpu.dot_dimension_numbers<[1], [0], [0], [1], [0, 0, 1, 1], [], []>} : vector<8x8xf32>, vector<8x288xf32>, vector<8x288xf32> -> vector<8x288xf32>
    %c1 = arith.constant 1 : index
    %c0_6 = arith.constant 0 : index
    %c0_7 = arith.constant 0 : index
    %9 = vector.load %arg2[%c1, %c0_6, %c0_7] : memref<9x8x8xf32, #tpu.memory_space<vmem>>, vector<1x8x8xf32>
    %10 = vector.shape_cast %9 : vector<1x8x8xf32> to vector<8x8xf32>
    %11 = vector.extract_strided_slice %4 {offsets = [0, 1], sizes = [8, 288], strides = [1, 1]} : vector<8x384xf32> to vector<8x288xf32>
    %cst_8 = arith.constant dense<0.000000e+00> : vector<8x288xf32>
    %12 = tpu.matmul %10, %11, %cst_8 {dimension_numbers = #tpu.dot_dimension_numbers<[1], [0], [0], [1], [0, 0, 1, 1], [], []>} : vector<8x8xf32>, vector<8x288xf32>, vector<8x288xf32> -> vector<8x288xf32>
    %13 = arith.addf %8, %12 : vector<8x288xf32>
    %c2 = arith.constant 2 : index
    %c0_9 = arith.constant 0 : index
    %c0_10 = arith.constant 0 : index
    %14 = vector.load %arg2[%c2, %c0_9, %c0_10] : memref<9x8x8xf32, #tpu.memory_space<vmem>>, vector<1x8x8xf32>
    %15 = vector.shape_cast %14 : vector<1x8x8xf32> to vector<8x8xf32>
    %16 = vector.extract_strided_slice %4 {offsets = [0, 2], sizes = [8, 288], strides = [1, 1]} : vector<8x384xf32> to vector<8x288xf32>
    %cst_11 = arith.constant dense<0.000000e+00> : vector<8x288xf32>
    %17 = tpu.matmul %15, %16, %cst_11 {dimension_numbers = #tpu.dot_dimension_numbers<[1], [0], [0], [1], [0, 0, 1, 1], [], []>} : vector<8x8xf32>, vector<8x288xf32>, vector<8x288xf32> -> vector<8x288xf32>
    %18 = arith.addf %13, %17 : vector<8x288xf32>
    %c3 = arith.constant 3 : index
    %c0_12 = arith.constant 0 : index
    %c0_13 = arith.constant 0 : index
    %19 = vector.load %arg2[%c3, %c0_12, %c0_13] : memref<9x8x8xf32, #tpu.memory_space<vmem>>, vector<1x8x8xf32>
    %20 = vector.shape_cast %19 : vector<1x8x8xf32> to vector<8x8xf32>
    %21 = vector.extract_strided_slice %4 {offsets = [0, 18], sizes = [8, 288], strides = [1, 1]} : vector<8x384xf32> to vector<8x288xf32>
    %cst_14 = arith.constant dense<0.000000e+00> : vector<8x288xf32>
    %22 = tpu.matmul %20, %21, %cst_14 {dimension_numbers = #tpu.dot_dimension_numbers<[1], [0], [0], [1], [0, 0, 1, 1], [], []>} : vector<8x8xf32>, vector<8x288xf32>, vector<8x288xf32> -> vector<8x288xf32>
    %23 = arith.addf %18, %22 : vector<8x288xf32>
    %c4 = arith.constant 4 : index
    %c0_15 = arith.constant 0 : index
    %c0_16 = arith.constant 0 : index
    %24 = vector.load %arg2[%c4, %c0_15, %c0_16] : memref<9x8x8xf32, #tpu.memory_space<vmem>>, vector<1x8x8xf32>
    %25 = vector.shape_cast %24 : vector<1x8x8xf32> to vector<8x8xf32>
    %26 = vector.extract_strided_slice %4 {offsets = [0, 19], sizes = [8, 288], strides = [1, 1]} : vector<8x384xf32> to vector<8x288xf32>
    %cst_17 = arith.constant dense<0.000000e+00> : vector<8x288xf32>
    %27 = tpu.matmul %25, %26, %cst_17 {dimension_numbers = #tpu.dot_dimension_numbers<[1], [0], [0], [1], [0, 0, 1, 1], [], []>} : vector<8x8xf32>, vector<8x288xf32>, vector<8x288xf32> -> vector<8x288xf32>
    %28 = arith.addf %23, %27 : vector<8x288xf32>
    %c5 = arith.constant 5 : index
    %c0_18 = arith.constant 0 : index
    %c0_19 = arith.constant 0 : index
    %29 = vector.load %arg2[%c5, %c0_18, %c0_19] : memref<9x8x8xf32, #tpu.memory_space<vmem>>, vector<1x8x8xf32>
    %30 = vector.shape_cast %29 : vector<1x8x8xf32> to vector<8x8xf32>
    %31 = vector.extract_strided_slice %4 {offsets = [0, 20], sizes = [8, 288], strides = [1, 1]} : vector<8x384xf32> to vector<8x288xf32>
    %cst_20 = arith.constant dense<0.000000e+00> : vector<8x288xf32>
    %32 = tpu.matmul %30, %31, %cst_20 {dimension_numbers = #tpu.dot_dimension_numbers<[1], [0], [0], [1], [0, 0, 1, 1], [], []>} : vector<8x8xf32>, vector<8x288xf32>, vector<8x288xf32> -> vector<8x288xf32>
    %33 = arith.addf %28, %32 : vector<8x288xf32>
    %c6 = arith.constant 6 : index
    %c0_21 = arith.constant 0 : index
    %c0_22 = arith.constant 0 : index
    %34 = vector.load %arg2[%c6, %c0_21, %c0_22] : memref<9x8x8xf32, #tpu.memory_space<vmem>>, vector<1x8x8xf32>
    %35 = vector.shape_cast %34 : vector<1x8x8xf32> to vector<8x8xf32>
    %36 = vector.extract_strided_slice %4 {offsets = [0, 36], sizes = [8, 288], strides = [1, 1]} : vector<8x384xf32> to vector<8x288xf32>
    %cst_23 = arith.constant dense<0.000000e+00> : vector<8x288xf32>
    %37 = tpu.matmul %35, %36, %cst_23 {dimension_numbers = #tpu.dot_dimension_numbers<[1], [0], [0], [1], [0, 0, 1, 1], [], []>} : vector<8x8xf32>, vector<8x288xf32>, vector<8x288xf32> -> vector<8x288xf32>
    %38 = arith.addf %33, %37 : vector<8x288xf32>
    %c7 = arith.constant 7 : index
    %c0_24 = arith.constant 0 : index
    %c0_25 = arith.constant 0 : index
    %39 = vector.load %arg2[%c7, %c0_24, %c0_25] : memref<9x8x8xf32, #tpu.memory_space<vmem>>, vector<1x8x8xf32>
    %40 = vector.shape_cast %39 : vector<1x8x8xf32> to vector<8x8xf32>
    %41 = vector.extract_strided_slice %4 {offsets = [0, 37], sizes = [8, 288], strides = [1, 1]} : vector<8x384xf32> to vector<8x288xf32>
    %cst_26 = arith.constant dense<0.000000e+00> : vector<8x288xf32>
    %42 = tpu.matmul %40, %41, %cst_26 {dimension_numbers = #tpu.dot_dimension_numbers<[1], [0], [0], [1], [0, 0, 1, 1], [], []>} : vector<8x8xf32>, vector<8x288xf32>, vector<8x288xf32> -> vector<8x288xf32>
    %43 = arith.addf %38, %42 : vector<8x288xf32>
    %c8 = arith.constant 8 : index
    %c0_27 = arith.constant 0 : index
    %c0_28 = arith.constant 0 : index
    %44 = vector.load %arg2[%c8, %c0_27, %c0_28] : memref<9x8x8xf32, #tpu.memory_space<vmem>>, vector<1x8x8xf32>
    %45 = vector.shape_cast %44 : vector<1x8x8xf32> to vector<8x8xf32>
    %46 = vector.extract_strided_slice %4 {offsets = [0, 38], sizes = [8, 288], strides = [1, 1]} : vector<8x384xf32> to vector<8x288xf32>
    %cst_29 = arith.constant dense<0.000000e+00> : vector<8x288xf32>
    %47 = tpu.matmul %45, %46, %cst_29 {dimension_numbers = #tpu.dot_dimension_numbers<[1], [0], [0], [1], [0, 0, 1, 1], [], []>} : vector<8x8xf32>, vector<8x288xf32>, vector<8x288xf32> -> vector<8x288xf32>
    %48 = arith.addf %43, %47 : vector<8x288xf32>
    %49 = arith.index_cast %arg0 : i32 to index
    %c0_30 = arith.constant 0 : index
    %c0_31 = arith.constant 0 : index
    %50 = vector.load %arg5[%49, %c0_30, %c0_31] : memref<2x8x288xf32, #tpu.memory_space<vmem>>, vector<1x8x288xf32>
    %51 = vector.shape_cast %50 : vector<1x8x288xf32> to vector<8x288xf32>
    %52 = vector.shape_cast %48 : vector<8x288xf32> to vector<1x8x288xf32>
    tpu.vector_store %arg5[%49, %c0_30, %c0_31], %52 {strides = array<i32>} : memref<2x8x288xf32, #tpu.memory_space<vmem>>, vector<1x8x288xf32>,
    %53 = tpu.iota {dimensions = array<i32: 1>} : vector<1x288xi32>
    %c18_i32 = arith.constant 18 : i32
    %c0_i32_32 = arith.constant 0 : i32
    %54 = arith.cmpi eq, %c18_i32, %c0_i32_32 : i32
    %c1_i32 = arith.constant 1 : i32
    %55 = arith.select %54, %c1_i32, %c18_i32 : i32
    %56 = vector.broadcast %55 : i32 to vector<1x288xi32>
    %57 = arith.remsi %53, %56 : vector<1x288xi32>
    %c0_i32_33 = arith.constant 0 : i32
    %58 = vector.broadcast %c0_i32_33 : i32 to vector<1x288xi32>
    %59 = arith.cmpi ne, %57, %58 : vector<1x288xi32>
    %c0_i32_34 = arith.constant 0 : i32
    %60 = vector.broadcast %c0_i32_34 : i32 to vector<1x288xi32>
    %61 = arith.cmpi slt, %57, %60 : vector<1x288xi32>
    %c0_i32_35 = arith.constant 0 : i32
    %62 = arith.cmpi slt, %55, %c0_i32_35 : i32
    %63 = vector.broadcast %62 : i1 to vector<1x288xi1>
    %64 = vector.broadcast %63 : vector<1x288xi1> to vector<1x288xi1>
    %65 = arith.xori %61, %64 : vector<1x288xi1>
    %66 = arith.andi %65, %59 : vector<1x288xi1>
    %67 = vector.broadcast %55 : i32 to vector<1x288xi32>
    %68 = arith.addi %57, %67 : vector<1x288xi32>
    %69 = arith.select %66, %68, %57 : vector<1x288xi1>, vector<1x288xi32>
    %c16_i32 = arith.constant 16 : i32
    %70 = vector.broadcast %c16_i32 : i32 to vector<1x288xi32>
    %71 = arith.cmpi slt, %69, %70 : vector<1x288xi32>
    %cst_36 = arith.constant 0.000000e+00 : f32
    %72 = vector.shape_cast %71 : vector<1x288xi1> to vector<1x288xi1>
    %73 = vector.broadcast %72 : vector<1x288xi1> to vector<8x288xi1>
    %74 = vector.broadcast %cst_36 : f32 to vector<8x288xf32>
    %75 = arith.select %73, %48, %74 : vector<8x288xi1>, vector<8x288xf32>
    %c0_37 = arith.constant 0 : index
    %c0_38 = arith.constant 0 : index
    %c0_39 = arith.constant 0 : index
    %76 = vector.load %arg6[%c0_37, %c0_38, %c0_39] : memref<1x8x1xf32, #tpu.memory_space<vmem>>, vector<1x8x1xf32>
    %cst_40 = arith.constant dense<0.000000e+00> : vector<8xf32>
    %77 = vector.multi_reduction <add>, %75, %cst_40 [1] : vector<8x288xf32> to vector<8xf32>
    %78 = vector.shape_cast %77 : vector<8xf32> to vector<8x1xf32>
    %79 = vector.shape_cast %78 : vector<8x1xf32> to vector<1x8x1xf32>
    %80 = arith.addf %76, %79 : vector<1x8x1xf32>
    %c0_41 = arith.constant 0 : index
    %c0_42 = arith.constant 0 : index
    %c0_43 = arith.constant 0 : index
    %81 = vector.load %arg6[%c0_41, %c0_42, %c0_43] : memref<1x8x1xf32, #tpu.memory_space<vmem>>, vector<1x8x1xf32>
    tpu.vector_store %arg6[%c0_41, %c0_42, %c0_43], %80 {strides = array<i32>} : memref<1x8x1xf32, #tpu.memory_space<vmem>>, vector<1x8x1xf32>,
    %c0_44 = arith.constant 0 : index
    %c0_45 = arith.constant 0 : index
    %c0_46 = arith.constant 0 : index
    %82 = vector.load %arg7[%c0_44, %c0_45, %c0_46] : memref<1x8x1xf32, #tpu.memory_space<vmem>>, vector<1x8x1xf32>
    %83 = arith.mulf %75, %75 : vector<8x288xf32>
    %cst_47 = arith.constant dense<0.000000e+00> : vector<8xf32>
    %84 = vector.multi_reduction <add>, %83, %cst_47 [1] : vector<8x288xf32> to vector<8xf32>
    %85 = vector.shape_cast %84 : vector<8xf32> to vector<8x1xf32>
    %86 = vector.shape_cast %85 : vector<8x1xf32> to vector<1x8x1xf32>
    %87 = arith.addf %82, %86 : vector<1x8x1xf32>
    %c0_48 = arith.constant 0 : index
    %c0_49 = arith.constant 0 : index
    %c0_50 = arith.constant 0 : index
    %88 = vector.load %arg7[%c0_48, %c0_49, %c0_50] : memref<1x8x1xf32, #tpu.memory_space<vmem>>, vector<1x8x1xf32>
    tpu.vector_store %arg7[%c0_48, %c0_49, %c0_50], %87 {strides = array<i32>} : memref<1x8x1xf32, #tpu.memory_space<vmem>>, vector<1x8x1xf32>,
    %c1_i32_51 = arith.constant 1 : i32
    %89 = arith.cmpi eq, %arg0, %c1_i32_51 : i32
    %90 = arith.extui %89 : i1 to i32
    %c0_i32_52 = arith.constant 0 : i32
    %91 = arith.cmpi ne, %90, %c0_i32_52 : i32
    scf.if %91 {
      %c0_53 = arith.constant 0 : index
      %c0_54 = arith.constant 0 : index
      %c0_55 = arith.constant 0 : index
      %92 = vector.load %arg6[%c0_53, %c0_54, %c0_55] : memref<1x8x1xf32, #tpu.memory_space<vmem>>, vector<1x8x1xf32>
      %cst_56 = arith.constant 0.001953125 : f32
      %93 = vector.broadcast %cst_56 : f32 to vector<1x8x1xf32>
      %94 = arith.mulf %92, %93 : vector<1x8x1xf32>
      %c0_57 = arith.constant 0 : index
      %c0_58 = arith.constant 0 : index
      %c0_59 = arith.constant 0 : index
      %95 = vector.load %arg7[%c0_57, %c0_58, %c0_59] : memref<1x8x1xf32, #tpu.memory_space<vmem>>, vector<1x8x1xf32>
      %cst_60 = arith.constant 0.001953125 : f32
      %96 = vector.broadcast %cst_60 : f32 to vector<1x8x1xf32>
      %97 = arith.mulf %95, %96 : vector<1x8x1xf32>
      %98 = arith.mulf %94, %94 : vector<1x8x1xf32>
      %99 = arith.subf %97, %98 : vector<1x8x1xf32>
      %cst_61 = arith.constant 0.000000e+00 : f32
      %100 = vector.broadcast %cst_61 : f32 to vector<1x8x1xf32>
      %101 = arith.maximumf %99, %100 : vector<1x8x1xf32>
      %c0_62 = arith.constant 0 : index
      %c0_63 = arith.constant 0 : index
      %c0_64 = arith.constant 0 : index
      %102 = vector.load %arg3[%c0_62, %c0_63, %c0_64] : memref<1x8x1xf32, #tpu.memory_space<vmem>>, vector<1x8x1xf32>
      %cst_65 = arith.constant 9.99999974E-6 : f32
      %103 = vector.broadcast %cst_65 : f32 to vector<1x8x1xf32>
      %104 = arith.addf %101, %103 : vector<1x8x1xf32>
      %105 = math.rsqrt %104 : vector<1x8x1xf32>
      %106 = arith.mulf %102, %105 : vector<1x8x1xf32>
      %c0_66 = arith.constant 0 : index
      %c0_67 = arith.constant 0 : index
      %c0_68 = arith.constant 0 : index
      %107 = vector.load %arg4[%c0_66, %c0_67, %c0_68] : memref<1x8x1xf32, #tpu.memory_space<vmem>>, vector<1x8x1xf32>
      %108 = arith.mulf %94, %106 : vector<1x8x1xf32>
      %109 = arith.subf %107, %108 : vector<1x8x1xf32>
      %c0_69 = arith.constant 0 : index
      %c0_70 = arith.constant 0 : index
      %c0_71 = arith.constant 0 : index
      %110 = vector.load %arg5[%c0_69, %c0_70, %c0_71] : memref<2x8x288xf32, #tpu.memory_space<vmem>>, vector<2x8x288xf32>
      %111 = vector.broadcast %106 : vector<1x8x1xf32> to vector<2x8x288xf32>
      %112 = arith.mulf %110, %111 : vector<2x8x288xf32>
      %113 = vector.broadcast %109 : vector<1x8x1xf32> to vector<2x8x288xf32>
      %114 = arith.addf %112, %113 : vector<2x8x288xf32>
      %cst_72 = arith.constant 0.000000e+00 : f32
      %115 = vector.broadcast %cst_72 : f32 to vector<2x8x288xf32>
      %116 = arith.cmpf oge, %114, %115 : vector<2x8x288xf32>
      %cst_73 = arith.constant 2.000000e-01 : f32
      %117 = vector.broadcast %cst_73 : f32 to vector<2x8x288xf32>
      %118 = arith.mulf %117, %114 : vector<2x8x288xf32>
      %119 = arith.select %116, %114, %118 : vector<2x8x288xi1>, vector<2x8x288xf32>
      %c0_74 = arith.constant 0 : index
      %c0_75 = arith.constant 0 : index
      %c0_76 = arith.constant 0 : index
      %120 = vector.load %arg5[%c0_74, %c0_75, %c0_76] : memref<2x8x288xf32, #tpu.memory_space<vmem>>, vector<2x8x288xf32>
      tpu.vector_store %arg5[%c0_74, %c0_75, %c0_76], %119 {strides = array<i32>} : memref<2x8x288xf32, #tpu.memory_space<vmem>>, vector<2x8x288xf32>,
    } else {
    }
    return
  }
  func.func @transform_0(%arg0: i32) -> (i32, i32, i32) {
    %c0_i32 = arith.constant 0 : i32
    %c0_i32_0 = arith.constant 0 : i32
    %c0_i32_1 = arith.constant 0 : i32
    return %arg0, %c0_i32, %c0_i32_0 : i32, i32, i32
  }
  func.func @transform_1(%arg0: i32) -> (i32, i32, i32) {
    %c0_i32 = arith.constant 0 : i32
    %c0_i32_0 = arith.constant 0 : i32
    %c0_i32_1 = arith.constant 0 : i32
    %c0_i32_2 = arith.constant 0 : i32
    return %c0_i32, %c0_i32_0, %c0_i32_1 : i32, i32, i32
  }
  func.func @transform_2(%arg0: i32) -> (i32, i32, i32) {
    %c0_i32 = arith.constant 0 : i32
    %c0_i32_0 = arith.constant 0 : i32
    %c0_i32_1 = arith.constant 0 : i32
    %c0_i32_2 = arith.constant 0 : i32
    return %c0_i32, %c0_i32_0, %c0_i32_1 : i32, i32, i32
  }
  func.func @transform_3(%arg0: i32) -> (i32, i32, i32) {
    %c0_i32 = arith.constant 0 : i32
    %c0_i32_0 = arith.constant 0 : i32
    %c0_i32_1 = arith.constant 0 : i32
    %c0_i32_2 = arith.constant 0 : i32
    return %c0_i32, %c0_i32_0, %c0_i32_1 : i32, i32, i32
  }
  func.func @transform_4(%arg0: i32) -> (i32, i32, i32) {
    %c0_i32 = arith.constant 0 : i32
    %c0_i32_0 = arith.constant 0 : i32
    %c0_i32_1 = arith.constant 0 : i32
    %c0_i32_2 = arith.constant 0 : i32
    return %c0_i32, %c0_i32_0, %c0_i32_1 : i32, i32, i32
  }
}

</mosaic_0001>

<bundles_post_ra>
// kernel: conv_bn_relu_pallas.1
= control target key start
LH: loop header
LB: loop body
LE: loop exit
PB: predicated region body
PF: predicated region fallthrough
CT: control target
= control target key end

     0   :  { %s1993_s15 = smov 0   ;;  %s2194_s0 = inlined_call_operand.vmem [shape: f32[2,8,384], index: 0, kind: input, shape index: {}]   ;;  %s2195_s1 = inlined_call_operand.vmem [shape: f32[9,8,8], index: 1, kind: input, shape index: {}]   ;;  %s2196_s2 = inlined_call_operand.vmem [shape: f32[1,8,1], index: 2, kind: input, shape index: {}]   ;;  %s2197_s3 = inlined_call_operand.vmem [shape: f32[1,8,1], index: 3, kind: input, shape index: {}]   ;;  %s2198_s4 = inlined_call_operand.vmem [shape: f32[2,8,288], index: 4, kind: output, shape index: {}]  }
   0x1 LB: > { %s1999_s16 = sadd.s32 4294967295, %s1954_s15   ;;  %p1821_p0 = scmp.ge.s32.totalorder %s1954_s15, 1  ;;  %s1954_s15 = sphi %s1993_s15, %s14_s15  }
   0x2   : > { %p157_p1 = scmp.lt.s32.totalorder %s1954_s15, 3 }
   0x4   : > { %p158_p2 = pnand %p1821_p0, %p157_p1 }
   0x5   : > { %p178_p3 = scmp.lt.s32.totalorder (!%p158_p2), %s1999_s16, 1  ;;  %p1823_p4 = scmp.ne.s32.totalorder (!%p158_p2), %s1999_s16, 0 }
   0x6   : > { %161 = sbr.rel (%p158_p2) target bundleno = 695 (0x2b7), region = 36 }
   0xb   : > { %s179_s17 = scalar_select %p178_p3, %s1999_s16, 1 }
   0xc   : > { %186 = sbr.rel (%p1823_p4) target bundleno = 19 (0x13), region = 40 }
   0xd   : > { %s1918_s18 = smul.u32 24, %s179_s17 }
   0xf   : > { %s182_s21 = scalar_lea.vmem %s2194_s0, %s1918_s18 }
  0x11   : > { %vm187_vm0 = vcmask 7168   ;;  %v1956_v0 = vmov 0.0  }
  0x12   : > { %188 = vst.msk [vmem:[#allocation2] sm:$0xff] %vm187_vm0, %v1956_v0  ;;  %189 = vst.msk [vmem:[#allocation3] sm:$0xff] %vm187_vm0, %v1956_v0 }
  0x13 PF: > { %v191_v1 = vld [vmem:[%s182_s21 + $0x8] sm:$0xff]  ;;  %v2009_v2 = vld [vmem:[%s182_s21] sm:$0xff]  ;;  %s1957_s22 = smov 127   ;;  %v192_v3 = vld [vmem:[%s182_s21 + $0x10] sm:$0xff]  ;;  %v1958_v4 = vmov 0.0   ;;  %vm1959_vm1 = vmmov 0   ;;  %v1634_v54 = vlaneseq }
  0x14   : > { %201 = vrot.lane.b32.xlu0 %v191_v1, %s1957_s22  ;;  %199 = vrot.lane.b32.xlu1 %v2009_v2, %s1957_s22  ;;  %s1960_s23 = smov 126   ;;  %s1961_s24 = smov 110   ;;  %vm205_vm2 = vcmask 1039360   ;;  %v1824_v7 = vld [vmem:[%s2195_s1 + $0x8] sm:$0xff]  ;;  %vm211_vm3 = vcmask 64512   ;;  %vm508_vm4 = vcmask 1031168  }
  0x15   : > { %1873 = vmatprep.subr.mxu1 %v1958_v4  ;;  %1875 = vmatprep.mubr.msk.f32.mxu1 %vm1959_vm1, %v1958_v4  ;;  %s1962_s25 = smov 109   ;;  %s1963_s26 = smov 108   ;;  %v193_v14 = vld [vmem:[%s2195_s1] sm:$0xff]  ;;  %vm669_vm5 = vcmask 900096   ;;  %v1829_v18 = vld [vmem:[%s2195_s1 + $0x10] sm:$0xff]  ;;  %v1832_v23 = vld [vmem:[%s2195_s1 + $0x18] sm:$0xff] }
  0x16   : > { %279 = vmatprep.mubr.f32.mxu0 %v1958_v4  ;;  %s1964_s27 = smov 92   ;;  %s1965_s28 = smov 91   ;;  %vm830_vm6 = vcmask 891904   ;;  %v1835_v29 = vld [vmem:[%s2195_s1 + $0x20] sm:$0xff]  ;;  %vm991_vm7 = vcmask 883712   ;;  %v1838_v33 = vld [vmem:[%s2195_s1 + $0x28] sm:$0xff] }
  0x17   : > { %s1966_s29 = smov 90   ;;  %vm1152_vm8 = vcmask 752640   ;;  %v1841_v37 = vld [vmem:[%s2195_s1 + $0x30] sm:$0xff]  ;;  %vm1313_vm9 = vcmask 744448   ;;  %v1844_v42 = vld [vmem:[%s2195_s1 + $0x38] sm:$0xff]  ;;  %vm1474_vm10 = vcmask 736256  }
  0x18   : > { %203 = vrot.lane.b32.xlu0 %v192_v3, %s1957_s22  ;;  %504 = vrot.lane.b32.xlu1 %v191_v1, %s1960_s23  ;;  %v1847_v49 = vld [vmem:[%s2195_s1 + $0x40] sm:$0xff]  ;;  %v1635_v58 = vand.u32 127, %v1634_v54  ;;  %p1851_p5 = scmp.ne.s32.totalorder %s1999_s16, 1 }
  0x1a   : > { %v1637_v61 = vadd.s32 256, %v1635_v58 }
  0x1c   : > { %506 = vrot.lane.b32.xlu0 %v192_v3, %s1960_s23  ;;  %502 = vrot.lane.b32.xlu1 %v2009_v2, %s1960_s23 }
  0x20   : > { %665 = vrot.lane.b32.xlu0 %v191_v1, %s1961_s24  ;;  %667 = vrot.lane.b32.xlu1 %v192_v3, %s1961_s24 }
  0x24   : > { %663 = vrot.lane.b32.xlu0 %v2009_v2, %s1961_s24  ;;  %826 = vrot.lane.b32.xlu1 %v191_v1, %s1962_s25  ;;  %s1854_s24 = smul.u32 24, %s1999_s16 }
  0x28   : > { %828 = vrot.lane.b32.xlu0 %v192_v3, %s1962_s25  ;;  %824 = vrot.lane.b32.xlu1 %v2009_v2, %s1962_s25 }
  0x2c   : > { %987 = vrot.lane.b32.xlu0 %v191_v1, %s1963_s26  ;;  %989 = vrot.lane.b32.xlu1 %v192_v3, %s1963_s26 }
  0x30   : > { %985 = vrot.lane.b32.xlu0 %v2009_v2, %s1963_s26  ;;  %1148 = vrot.lane.b32.xlu1 %v191_v1, %s1964_s27 }
  0x34   : > { %1150 = vrot.lane.b32.xlu0 %v192_v3, %s1964_s27  ;;  %1146 = vrot.lane.b32.xlu1 %v2009_v2, %s1964_s27  ;;  %s1629_s27 = scalar_lea.vmem %s2198_s4, %s1854_s24 }
  0x38   : > { %1309 = vrot.lane.b32.xlu0 %v191_v1, %s1965_s28  ;;  %1311 = vrot.lane.b32.xlu1 %v192_v3, %s1965_s28 }
  0x3c   : > { %1307 = vrot.lane.b32.xlu0 %v2009_v2, %s1965_s28  ;;  %1470 = vrot.lane.b32.xlu1 %v191_v1, %s1966_s29 }
  0x40   : > { %1472 = vrot.lane.b32.xlu0 %v192_v3, %s1966_s29  ;;  %1468 = vrot.lane.b32.xlu1 %v2009_v2, %s1966_s29 }
  0x86   : > { %v202_v5 = vpop.permute.xlu0 %201  ;;  %v200_v6 = vpop.permute.xlu1 %199 }
  0x87   : > { %v206_v11 = vsel %vm205_vm2, %v200_v6, %v202_v5 }
  0x8a   : > { %v204_v8 = vpop.permute.xlu0 %203  ;;  %v505_v9 = vpop.permute.xlu1 %504 }
  0x8b   : > { %1874 = vmatpush3.msra.mxu1 %v204_v8  ;;  %v207_v10 = vsel %vm205_vm2, %v202_v5, %v204_v8 }
  0x8c   : > { %245 = vmatprep.subr.mxu0 %v207_v10  ;;  %1876 = vmatmul.mubr.msk.f32.vlgmr.msra.gmra.mxu1 %vm211_vm3, %v1824_v7 }
  0x8d   : > { %246 = vmatpush1.msra.mxu0 %v206_v11  ;;  %1878 = vmatprep.subr.mxu1 %v1958_v4 }
  0x8e   : > { %1879 = vmatpush3.msra.mxu1 %v192_v3  ;;  %v507_v12 = vpop.permute.xlu0 %506  ;;  %1825 = vmatmul.mubr.msk.f32.vlgmr.msra.gmra.mxu0 %vm211_vm3, %v1824_v7  ;;  %v503_v13 = vpop.permute.xlu1 %502 }
  0x8f   : > { %389 = vmatprep.subr.mxu0 %v191_v1  ;;  %1880 = vmatprep.mubr.msk.f32.mxu1 %vm1959_vm1, %v1958_v4  ;;  %v510_v15 = vsel %vm508_vm4, %v505_v9, %v507_v12  ;;  %v509_v19 = vsel %vm508_vm4, %v503_v13, %v505_v9  ;;  %v2112_v9 = vmul.u32.u64.low 3817748708, %v1635_v58  ;;  %v2113_v10 = vmul.u32.u64.high 3817748708, %v1635_v58, %v2112_v9 }
  0x90   : > { %390 = vmatpush1.msra.mxu0 %v2009_v2  ;;  %1883 = vmatprep.subr.mxu1 %v1958_v4  ;;  %v2109_v2 = vmul.u32.u64.low 3817748708, %v1637_v61  ;;  %v2110_v3 = vmul.u32.u64.high 3817748708, %v1637_v61, %v2109_v2 }
  0x91   : > { %1881 = vmatmul.mubr.msk.f32.vlgmr.msra.gmra.mxu1 %vm211_vm3, %v193_v14  ;;  %547 = vmatprep.subr.mxu0 %v510_v15 }
  0x92   : > { %1884 = vmatpush3.msra.mxu1 %v507_v12  ;;  %423 = vmatprep.mubr.f32.mxu0 %v1958_v4  ;;  %v666_v16 = vpop.permute.xlu0 %665  ;;  %v668_v17 = vpop.permute.xlu1 %667 }
  0x93   : > { %1827 = vmatmul.mubr.msk.f32.vlgmr.msra.gmra.mxu0 %vm211_vm3, %v193_v14  ;;  %1885 = vmatprep.mubr.msk.f32.mxu1 %vm1959_vm1, %v1958_v4  ;;  %v671_v20 = vsel %vm669_vm5, %v666_v16, %v668_v17 }
  0x94   : > { %548 = vmatpush1.msra.mxu0 %v509_v19  ;;  %1888 = vmatprep.subr.mxu1 %v1958_v4 }
  0x95   : > { %1886 = vmatmul.mubr.msk.f32.vlgmr.msra.gmra.mxu1 %vm211_vm3, %v1829_v18  ;;  %708 = vmatprep.subr.mxu0 %v671_v20 }
  0x96   : > { %1889 = vmatpush3.msra.mxu1 %v668_v17  ;;  %581 = vmatprep.mubr.f32.mxu0 %v1958_v4  ;;  %v664_v21 = vpop.permute.xlu0 %663  ;;  %v827_v22 = vpop.permute.xlu1 %826  ;;  %v1666_v17 = vshrl.u32 %v2110_v3, 4 }
  0x97   : > { %v670_v24 = vsel %vm669_vm5, %v664_v21, %v666_v16  ;;  %1830 = vmatmul.mubr.msk.f32.vlgmr.msra.gmra.mxu0 %vm211_vm3, %v1829_v18  ;;  %1890 = vmatprep.mubr.msk.f32.mxu1 %vm1959_vm1, %v1958_v4  ;;  %v1644_v21 = vshrl.u32 %v2113_v10, 4  ;;  %vm1632_vm5 = vcmask 261120  }
  0x98   : > { %709 = vmatpush1.msra.mxu0 %v670_v24  ;;  %742 = vmatprep.mubr.f32.mxu0 %v1958_v4 }
  0x99   : > { %1893 = vmatprep.subr.mxu1 %v1958_v4  ;;  %1891 = vmatmul.mubr.msk.f32.vlgmr.msra.gmra.mxu1 %vm211_vm3, %v1832_v23 }
  0x9a   : > { %v829_v25 = vpop.permute.xlu0 %828  ;;  %v825_v26 = vpop.permute.xlu1 %824  ;;  %1895 = vmatprep.mubr.msk.f32.mxu1 %vm1959_vm1, %v1958_v4 }
  0x9b   : > { %1833 = vmatmul.mubr.msk.f32.vlgmr.msra.gmra.mxu0 %vm211_vm3, %v1832_v23  ;;  %v831_v27 = vsel %vm830_vm6, %v825_v26, %v827_v22  ;;  %1894 = vmatpush3.msra.mxu1 %v829_v25  ;;  %v832_v28 = vsel %vm830_vm6, %v827_v22, %v829_v25  ;;  %v1667_v23 = vmul.u32 18, %v1666_v17 }
  0x9c   : > { %869 = vmatprep.subr.mxu0 %v832_v28  ;;  %903 = vmatprep.mubr.f32.mxu0 %v1958_v4 }
  0x9d   : > { %870 = vmatpush1.msra.mxu0 %v831_v27  ;;  %1898 = vmatprep.subr.mxu1 %v1958_v4 }
  0x9e   : > { %v988_v30 = vpop.permute.xlu0 %987  ;;  %v990_v31 = vpop.permute.xlu1 %989  ;;  %1896 = vmatmul.mubr.msk.f32.vlgmr.msra.gmra.mxu1 %vm211_vm3, %v1835_v29 }
  0x9f   : > { %1836 = vmatmul.mubr.msk.f32.vlgmr.msra.gmra.mxu0 %vm211_vm3, %v1835_v29  ;;  %v993_v32 = vsel %vm991_vm7, %v988_v30, %v990_v31  ;;  %1899 = vmatpush3.msra.mxu1 %v990_v31  ;;  %v1668_v31 = vsub.s32 %v1637_v61, %v1667_v23 }
  0xa0   : > { %1030 = vmatprep.subr.mxu0 %v993_v32  ;;  %1900 = vmatprep.mubr.msk.f32.mxu1 %vm1959_vm1, %v1958_v4 }
  0xa1   : > { %1064 = vmatprep.mubr.f32.mxu0 %v1958_v4  ;;  %1903 = vmatprep.subr.mxu1 %v1958_v4  ;;  %vm1673_vm11 = vcmp.ne.s32.totalorder %v1668_v31, 0  ;;  %vm1676_vm12 = vcmp.lt.s32.totalorder %v1668_v31, 0 }
  0xa2   : > { %v986_v34 = vpop.permute.xlu0 %985  ;;  %v1149_v35 = vpop.permute.xlu1 %1148  ;;  %1901 = vmatmul.mubr.msk.f32.vlgmr.msra.gmra.mxu1 %vm211_vm3, %v1838_v33  ;;  %vm2121_vm13 = vmand %vm1676_vm12, %vm1673_vm11 }
  0xa3   : > { %v992_v36 = vsel %vm991_vm7, %v986_v34, %v988_v30  ;;  %1905 = vmatprep.mubr.msk.f32.mxu1 %vm1959_vm1, %v1958_v4  ;;  %v1645_v30 = vmul.u32 18, %v1644_v21 }
  0xa4   : > { %1031 = vmatpush1.msra.mxu0 %v992_v36 }
  0xa5   : > { %1839 = vmatmul.mubr.msk.f32.vlgmr.msra.gmra.mxu0 %vm211_vm3, %v1838_v33 }
  0xa6   : > { %v1151_v38 = vpop.permute.xlu0 %1150  ;;  %v1147_v39 = vpop.permute.xlu1 %1146  ;;  %1225 = vmatprep.mubr.f32.mxu0 %v1958_v4 }
  0xa7   : > { %v1153_v40 = vsel %vm1152_vm8, %v1147_v39, %v1149_v35  ;;  %1904 = vmatpush3.msra.mxu1 %v1151_v38  ;;  %v1154_v41 = vsel %vm1152_vm8, %v1149_v35, %v1151_v38  ;;  %v1646_v38 = vsub.s32 %v1635_v58, %v1645_v30  ;;  %vm1705_vm8 = vcmask 7168  }
  0xa8   : > { %1191 = vmatprep.subr.mxu0 %v1154_v41  ;;  %1906 = vmatmul.mubr.msk.f32.vlgmr.msra.gmra.mxu1 %vm211_vm3, %v1841_v37 }
  0xa9   : > { %1192 = vmatpush1.msra.mxu0 %v1153_v40  ;;  %1908 = vmatprep.subr.mxu1 %v1958_v4  ;;  %vm1671_vm14 = vcmp.ne.s32.totalorder %v1646_v38, 0  ;;  %vm1674_vm15 = vcmp.lt.s32.totalorder %v1646_v38, 0 }
  0xaa   : > { %v1310_v43 = vpop.permute.xlu0 %1309  ;;  %1842 = vmatmul.mubr.msk.f32.vlgmr.msra.gmra.mxu0 %vm211_vm3, %v1841_v37  ;;  %v1312_v44 = vpop.permute.xlu1 %1311  ;;  %1910 = vmatprep.mubr.msk.f32.mxu1 %vm1959_vm1, %v1958_v4  ;;  %vm2128_vm2 = vmand %vm1674_vm15, %vm1671_vm14 }
  0xab   : > { %1909 = vmatpush3.msra.mxu1 %v1312_v44  ;;  %v1315_v45 = vsel %vm1313_vm9, %v1310_v43, %v1312_v44  ;;  %1386 = vmatprep.mubr.f32.mxu0 %v1958_v4  ;;  %v1682_v44 = vadd.s32 18, %v1668_v31 }
  0xac   : > { %1352 = vmatprep.subr.mxu0 %v1315_v45  ;;  %1911 = vmatmul.mubr.msk.f32.vlgmr.msra.gmra.mxu1 %vm211_vm3, %v1844_v42 }
  0xad   : > { %1913 = vmatprep.subr.mxu1 %v1958_v4  ;;  %1915 = vmatprep.mubr.msk.f32.mxu1 %vm1959_vm1, %v1958_v4  ;;  %v1685_v54 = vsel %vm2121_vm13, %v1682_v44, %v1668_v31 }
  0xae   : > { %v1308_v46 = vpop.permute.xlu0 %1307  ;;  %v1471_v47 = vpop.permute.xlu1 %1470  ;;  %vm1688_vm4 = vcmp.lt.s32.totalorder %v1685_v54, 16 }
  0xaf   : > { %v1314_v48 = vsel %vm1313_vm9, %v1308_v46, %v1310_v43 }
  0xb0   : > { %1353 = vmatpush1.msra.mxu0 %v1314_v48 }
  0xb1   : > { %1845 = vmatmul.mubr.msk.f32.vlgmr.msra.gmra.mxu0 %vm211_vm3, %v1844_v42 }
  0xb2   : > { %v1473_v50 = vpop.permute.xlu0 %1472  ;;  %v1469_v51 = vpop.permute.xlu1 %1468  ;;  %1547 = vmatprep.mubr.f32.mxu0 %v1958_v4  ;;  %v1636_v4 = vadd.s32 128, %v1635_v58 }
  0xb3   : > { %v1475_v52 = vsel %vm1474_vm10, %v1469_v51, %v1471_v47  ;;  %1914 = vmatpush3.msra.mxu1 %v1473_v50  ;;  %v1476_v53 = vsel %vm1474_vm10, %v1471_v47, %v1473_v50 }
  0xb4   : > { %1513 = vmatprep.subr.mxu0 %v1476_v53  ;;  %1916 = vmatmul.mubr.msk.f32.vlgmr.msra.gmra.mxu1 %vm211_vm3, %v1847_v49  ;;  %v2115_v11 = vmul.u32.u64.low 3817748708, %v1636_v4  ;;  %v2116_v12 = vmul.u32.u64.high 3817748708, %v1636_v4, %v2115_v11 }
  0xb5   : > { %1514 = vmatpush1.msra.mxu0 %v1475_v52 }
  0xb6   : > { %1848 = vmatmul.mubr.msk.f32.vlgmr.msra.gmra.mxu0 %vm211_vm3, %v1847_v49  ;;  %v1655_v24 = vshrl.u32 %v2116_v12, 4  ;;  %v1680_v49 = vadd.s32 18, %v1646_v38 }
  0xb8   : > { %v1656_v32 = vmul.u32 18, %v1655_v24  ;;  %v1683_v2 = vsel %vm2128_vm2, %v1680_v49, %v1646_v38 }
  0xb9   : > { %vm1686_vm6 = vcmp.lt.s32.totalorder %v1683_v2, 16 }
  0xba   : > { %v1657_v40 = vsub.s32 %v1636_v4, %v1656_v32 }
  0xbc   : > { %vm1672_vm0 = vcmp.ne.s32.totalorder %v1657_v40, 0  ;;  %vm1675_vm1 = vcmp.lt.s32.totalorder %v1657_v40, 0 }
  0xbd   : > { %vm2132_vm3 = vmand %vm1675_vm1, %vm1672_vm0 }
 0x14c   : > { %v352_v55 = vpop.f32.mrf.mxu1 }
 0x14e   : > { %v281_v56 = vpop.f32.mrf.mxu0  ;;  %v1877_v57 = vpop.f32.mrf.mxu1 }
 0x150   : > { %v283_v59 = vpop.f32.mrf.mxu0 }
 0x151   : > { %v496_v60 = vpop.f32.mrf.mxu1 }
 0x152   : > { %v497_v18 = vadd.f32 %v496_v60, %v352_v55  ;;  %v1681_v60 = vadd.s32 18, %v1657_v40 }
 0x153   : > { %v425_v62 = vpop.f32.mrf.mxu0  ;;  %v1882_v63 = vpop.f32.mrf.mxu1 }
 0x154   : > { %v426_v28 = vadd.f32 %v425_v62, %v281_v56 }
 0x155   : > { %v427_v0 = vpop.f32.mrf.mxu0  ;;  %v654_v1 = vpop.f32.mrf.mxu1 }
 0x156   : > { %v660_v25 = vadd.f32 %v654_v1, %v497_v18  ;;  %v428_v36 = vadd.f32 %v427_v0, %v283_v59 }
 0x157   : > { %v583_v5 = vpop.f32.mrf.mxu0  ;;  %v1887_v6 = vpop.f32.mrf.mxu1 }
 0x158   : > { %v658_v37 = vadd.f32 %v583_v5, %v426_v28  ;;  %v1707_v28 = vld [vmem:[#allocation3] sm:$0xff] }
 0x159   : > { %v585_v7 = vpop.f32.mrf.mxu0  ;;  %v815_v8 = vpop.f32.mrf.mxu1 }
 0x15a   : > { %v821_v33 = vadd.f32 %v815_v8, %v660_v25  ;;  %v659_v45 = vadd.f32 %v585_v7, %v428_v36  ;;  %v1684_v7 = vsel %vm2132_vm3, %v1681_v60, %v1657_v40 }
 0x15b   : > { %v744_v13 = vpop.f32.mrf.mxu0  ;;  %v1892_v14 = vpop.f32.mrf.mxu1  ;;  %vm1687_vm7 = vcmp.lt.s32.totalorder %v1684_v7, 16 }
 0x15c   : > { %v819_v46 = vadd.f32 %v744_v13, %v658_v37 }
 0x15d   : > { %v746_v15 = vpop.f32.mrf.mxu0 }
 0x15e   : > { %v976_v16 = vpop.f32.mrf.mxu1  ;;  %v820_v50 = vadd.f32 %v746_v15, %v659_v45 }
 0x15f   : > { %v905_v19 = vpop.f32.mrf.mxu0  ;;  %v982_v41 = vadd.f32 %v976_v16, %v821_v33 }
 0x160   : > { %v1897_v20 = vpop.f32.mrf.mxu1  ;;  %v980_v51 = vadd.f32 %v905_v19, %v819_v46 }
 0x161   : > { %v907_v26 = vpop.f32.mrf.mxu0 }
 0x162   : > { %v1137_v22 = vpop.f32.mrf.mxu1  ;;  %v981_v56 = vadd.f32 %v907_v26, %v820_v50  ;;  %v1698_v26 = vld [vmem:[#allocation2] sm:$0xff] }
 0x163   : > { %v1143_v52 = vadd.f32 %v1137_v22, %v982_v41 }
 0x164   : > { %v1902_v27 = vpop.f32.mrf.mxu1 }
 0x165   : > { %v1066_v29 = vpop.f32.mrf.mxu0 }
 0x166   : > { %v1141_v57 = vadd.f32 %v1066_v29, %v980_v51 }
 0x167   : > { %v1068_v34 = vpop.f32.mrf.mxu0 }
 0x168   : > { %v1298_v35 = vpop.f32.mrf.mxu1  ;;  %v1142_v62 = vadd.f32 %v1068_v34, %v981_v56 }
 0x169   : > { %v1304_v58 = vadd.f32 %v1298_v35, %v1143_v52 }
 0x16a   : > { %v1907_v39 = vpop.f32.mrf.mxu1  ;;  %v1227_v42 = vpop.f32.mrf.mxu0 }
 0x16b   : > { %v1302_v63 = vadd.f32 %v1227_v42, %v1141_v57 }
 0x16c   : > { %v1459_v43 = vpop.f32.mrf.mxu1  ;;  %v1229_v53 = vpop.f32.mrf.mxu0 }
 0x16d   : > { %v1465_v0 = vadd.f32 %v1459_v43, %v1304_v58  ;;  %v1303_v4 = vadd.f32 %v1229_v53, %v1142_v62 }
 0x16e   : > { %v1912_v48 = vpop.f32.mrf.mxu1 }
 0x171   : > { %v1388_v59 = vpop.f32.mrf.mxu0 }
 0x172   : > { %v1463_v5 = vadd.f32 %v1388_v59, %v1302_v63 }
 0x173   : > { %v1390_v1 = vpop.f32.mrf.mxu0 }
 0x174   : > { %v1620_v3 = vpop.f32.mrf.mxu1  ;;  %v1464_v10 = vadd.f32 %v1390_v1, %v1303_v4 }
 0x175   : > { %v1626_v6 = vadd.f32 %v1620_v3, %v1465_v0 }
 0x176   : > { %v1549_v8 = vpop.f32.mrf.mxu0  ;;  %v1917_v9 = vpop.f32.mrf.mxu1 }
 0x177   : > { %v1624_v11 = vadd.f32 %v1549_v8, %v1463_v5  ;;  %1633 = vst.msk [vmem:[%s1629_s27 + $0x10] sm:$0xff] %vm1632_vm5, %v1626_v6  ;;  %v1697_v12 = vsel %vm1688_vm4, %v1626_v6, 0.0 }
 0x178   : > { %v1551_v13 = vpop.f32.mrf.mxu0  ;;  %v1710_v16 = vmul.f32 %v1697_v12, %v1697_v12  ;;  %v1700_v21 = vsel %vm1632_vm5, %v1697_v12, 0.0 }
 0x179   : > { %1630 = vst [vmem:[%s1629_s27] sm:$0xff] %v1624_v11  ;;  %v1695_v14 = vsel %vm1686_vm6, %v1624_v11, 0.0  ;;  %v1625_v15 = vadd.f32 %v1551_v13, %v1464_v10 }
 0x17a   : > { %v1708_v18 = vmul.f32 %v1695_v14, %v1695_v14  ;;  %v1712_v24 = vsel %vm1632_vm5, %v1710_v16, 0.0 }
 0x17b   : > { %1631 = vst [vmem:[%s1629_s27 + $0x8] sm:$0xff] %v1625_v15  ;;  %v1696_v17 = vsel %vm1687_vm7, %v1625_v15, 0.0 }
 0x17c   : > { %v1709_v19 = vmul.f32 %v1696_v17, %v1696_v17  ;;  %v1699_v20 = vadd.f32 %v1696_v17, %v1695_v14 }
 0x17e   : > { %v1701_v22 = vadd.f32 %v1700_v21, %v1699_v20  ;;  %v1711_v23 = vadd.f32 %v1709_v19, %v1708_v18 }
 0x180   : > { %1702 = vadd.xlane.f32.xlu0 %v1701_v22  ;;  %v1713_v25 = vadd.f32 %v1712_v24, %v1711_v23 }
 0x182   : > { %1714 = vadd.xlane.f32.xlu1 %v1713_v25 }
 0x209   : > { %v1703_v27 = vpop.xlane.xlu0 %1702 }
 0x20a   : > { %v1704_v29 = vadd.f32 %v1703_v27, %v1698_v26  ;;  %1721 = sbr.rel (%p1851_p5) target bundleno = 695 (0x2b7), region = 44 }
 0x20b   : > { %v1715_v30 = vpop.xlane.xlu1 %1714 }
 0x20c   : > { %1706 = vst.msk [vmem:[#allocation2] sm:$0xff] %vm1705_vm8, %v1704_v29  ;;  %v1716_v31 = vadd.f32 %v1715_v30, %v1707_v28 }
 0x20e   : > { %1717 = vst.msk [vmem:[#allocation3] sm:$0xff] %vm1705_vm8, %v1716_v31 }
 0x20f   : > { %v1967_v34 = vmov 0   ;;  %v1729_v41 = vld [vmem:[%s2196_s2] sm:$0xff]  ;;  %v1737_v49 = vld [vmem:[%s2198_s4 + $0x8] sm:$0xff]  ;;  %v1738_v50 = vld [vmem:[%s2198_s4 + $0x10] sm:$0xff] }
 0x210   : > { %1945 = vset.pattern.permute.xlu0 %v1967_v34  ;;  %v1733_v44 = vld [vmem:[%s2197_s3] sm:$0xff]  ;;  %v1739_v51 = vld [vmem:[%s2198_s4 + $0x18] sm:$0xff]  ;;  %v1741_v53 = vld [vmem:[%s2198_s4 + $0x28] sm:$0xff] }
 0x211   : > { %v1736_v47 = vld [vmem:[%s2198_s4] sm:$0xff] }
 0x212   : > { %v1740_v52 = vld [vmem:[%s2198_s4 + $0x20] sm:$0xff] }
 0x213   : > { %v1722_v32 = vld [vmem:[#allocation2] sm:$0xff] }
 0x214   : > { %v1723_v35 = vmul.f32 0.001953125, %v1722_v32 }
 0x215   : > { %v1724_v33 = vld [vmem:[#allocation3] sm:$0xff] }
 0x216   : > { %v1725_v36 = vmul.f32 0.001953125, %v1724_v33  ;;  %v1726_v37 = vmul.f32 %v1723_v35, %v1723_v35 }
 0x218   : > { %v1727_v38 = vsub.f32 %v1725_v36, %v1726_v37 }
 0x21a   : > { %v1728_v39 = vmax.f32 %v1727_v38, 0.0 }
 0x21c   : > { %v1730_v40 = vadd.f32 1e-05, %v1728_v39 }
 0x21e   : > { %1946 = vrsqrt.f32 %v1730_v40 }
 0x22b   : > { %v1947_v42 = vpop.eup %1946 }
 0x22c   : > { %v1732_v43 = vmul.f32 %v1947_v42, %v1729_v41 }
 0x22e   : > { %1744 = vperm.xlu0 %1945, %v1732_v43   ;;  %v1734_v45 = vmul.f32 %v1732_v43, %v1723_v35 }
 0x230   : > { %v1735_v46 = vsub.f32 %v1733_v44, %v1734_v45 }
 0x232   : > { %1755 = vperm.xlu0 %1945, %v1735_v46  }
 0x2a9   : > { %v1745_v48 = vpop.permute.xlu0 %1744 }
 0x2aa   : > { %v1747_v54 = vmul.f32 %v1745_v48, %v1736_v47  ;;  %v1748_v55 = vmul.f32 %v1745_v48, %v1737_v49  ;;  %v1749_v56 = vmul.f32 %v1745_v48, %v1738_v50  ;;  %v1750_v57 = vmul.f32 %v1745_v48, %v1739_v51 }
 0x2ab   : > { %v1751_v58 = vmul.f32 %v1745_v48, %v1740_v52  ;;  %v1752_v59 = vmul.f32 %v1745_v48, %v1741_v53 }
 0x2ad   : > { %v1756_v60 = vpop.permute.xlu0 %1755 }
 0x2ae   : > { %v1758_v61 = vadd.f32 %v1756_v60, %v1747_v54  ;;  %v1759_v62 = vadd.f32 %v1756_v60, %v1748_v55  ;;  %v1760_v63 = vadd.f32 %v1756_v60, %v1749_v56  ;;  %v1761_v0 = vadd.f32 %v1756_v60, %v1750_v57 }
 0x2af   : > { %v1762_v1 = vadd.f32 %v1756_v60, %v1751_v58  ;;  %v1763_v2 = vadd.f32 %v1756_v60, %v1752_v59 }
 0x2b0   : > { %vm1764_vm9 = vcmp.ge.f32.partialorder %v1758_v61, 0.0  ;;  %vm1765_vm10 = vcmp.ge.f32.partialorder %v1759_v62, 0.0  ;;  %vm1766_vm11 = vcmp.ge.f32.partialorder %v1760_v63, 0.0  ;;  %vm1767_vm12 = vcmp.ge.f32.partialorder %v1761_v0, 0.0 }
 0x2b1   : > { %vm1768_vm13 = vcmp.ge.f32.partialorder %v1762_v1, 0.0  ;;  %vm1769_vm14 = vcmp.ge.f32.partialorder %v1763_v2, 0.0  ;;  %v1770_v3 = vmul.f32 0.2, %v1758_v61  ;;  %v1771_v4 = vmul.f32 0.2, %v1759_v62 }
 0x2b2   : > { %v1772_v5 = vmul.f32 0.2, %v1760_v63  ;;  %v1773_v6 = vmul.f32 0.2, %v1761_v0  ;;  %v1774_v7 = vmul.f32 0.2, %v1762_v1 }
 0x2b3   : > { %v1775_v8 = vmul.f32 0.2, %v1763_v2  ;;  %v1776_v9 = vsel %vm1764_vm9, %v1758_v61, %v1770_v3  ;;  %v1777_v10 = vsel %vm1765_vm10, %v1759_v62, %v1771_v4 }
 0x2b4   : > { %v1778_v11 = vsel %vm1766_vm11, %v1760_v63, %v1772_v5  ;;  %v1779_v12 = vsel %vm1767_vm12, %v1761_v0, %v1773_v6  ;;  %v1780_v13 = vsel %vm1768_vm13, %v1762_v1, %v1774_v7  ;;  %1782 = vst [vmem:[%s2198_s4] sm:$0xff] %v1776_v9  ;;  %1783 = vst [vmem:[%s2198_s4 + $0x8] sm:$0xff] %v1777_v10 }
 0x2b5   : > { %v1781_v14 = vsel %vm1769_vm14, %v1763_v2, %v1775_v8  ;;  %1784 = vst.msk [vmem:[%s2198_s4 + $0x10] sm:$0xff] %vm1632_vm5, %v1778_v11  ;;  %1785 = vst [vmem:[%s2198_s4 + $0x18] sm:$0xff] %v1779_v12 }
 0x2b6   : > { %1786 = vst [vmem:[%s2198_s4 + $0x20] sm:$0xff] %v1780_v13  ;;  %1787 = vst.msk [vmem:[%s2198_s4 + $0x28] sm:$0xff] %vm1632_vm5, %v1781_v14 }
 0x2b7 PF: > { %s14_s15 = sadd.s32 1, %s1954_s15  }
 0x2b8   : > { %p11_p6 = scmp.ge.s32.totalorder %s14_s15, 4  }
 0x2ba   :  { %13 = sbr.rel (!%p11_p6) target bundleno = 1 (0x1), region = 79 }

</bundles_post_ra>
